<compile_context>
chip_gen: v5e
topology: v5e:2x2
jax: 0.10.0
libtpu: 0.0.40
codegen_flags: <defaults>
</compile_context>

<pallas_src>
import functools
import math

import numpy as np

import jax
import jax.numpy as jnp
from jax.experimental import pallas as pl
from jax.experimental.pallas import tpu as pltpu


# ---------------------------------------------------------------------------
# Kernel
# ---------------------------------------------------------------------------
def _gf_kernel(x_ref, lf_ref, ws_ref, li_ref, shift_ref, o_ref):
    # x_ref:     (Bblk, N, Cblk) input block, native dtype, channels on lanes
    # lf_ref:    (f, N)      bf16 forward real-DFT operator (re rows | im rows)
    # ws_ref:    (f/2, Cblk) f32 per-channel real filter (ssf_scale folded in)
    # li_ref:    (N, f)      bf16 inverse real-DFT operator
    # shift_ref: (1, Cblk)   f32 per-channel SSF shift
    # o_ref:     (Bblk, N, Cblk) output block (x.dtype)
    ws = ws_ref[...]
    # The real filter multiplies the re and im halves identically; duplicate
    # once in VMEM instead of shipping a doubled filter from HBM.
    ws2 = jnp.concatenate([ws, ws], axis=0)                    # (f, Cblk) f32
    shift = shift_ref[...]                                     # (1, Cblk) f32

    for i in range(x_ref.shape[0]):                            # static unroll over Bblk
        xb = x_ref[i]                                          # (N, Cblk), native dtype
        x32 = xb.astype(jnp.float32)                           # residual in f32
        # forward 2-D real DFT (MXU: bf16 inputs, f32 accumulation)
        t = jnp.dot(lf_ref[...], xb.astype(jnp.bfloat16),
                    preferred_element_type=jnp.float32)        # (f, Cblk) f32
        t = t * ws2                                            # filter (+ ssf_scale)
        # inverse 2-D real DFT
        y = jnp.dot(li_ref[...], t.astype(jnp.bfloat16),
                    preferred_element_type=jnp.float32)        # (N, Cblk) f32
        o_ref[i] = (y + shift + x32).astype(o_ref.dtype)       # SSF shift + residual


# ---------------------------------------------------------------------------
# Dense real-DFT operators (norm='ortho'), built once per (a, b) with numpy.
# ---------------------------------------------------------------------------
def _dft_mats_np(a, b):
    wf = b // 2 + 1
    q = np.arange(b, dtype=np.float64)[:, None]
    v = np.arange(wf, dtype=np.float64)[None, :]
    ang_b = 2.0 * np.pi * q * v / b
    cb = np.cos(ang_b) / math.sqrt(b)            # (b, wf)
    sb = np.sin(ang_b) / math.sqrt(b)            # (b, wf)

    u = np.arange(a, dtype=np.float64)[:, None]
    p = np.arange(a, dtype=np.float64)[None, :]
    ang_a = 2.0 * np.pi * u * p / a
    fc = np.cos(ang_a) / math.sqrt(a)            # (a, a), symmetric
    fs = np.sin(ang_a) / math.sqrt(a)            # (a, a), symmetric

    vi = np.arange(wf, dtype=np.float64)[:, None]
    qi = np.arange(b, dtype=np.float64)[None, :]
    ang_i = 2.0 * np.pi * vi * qi / b
    cond = (vi == 0)
    if b % 2 == 0:
        cond = cond | (vi == b // 2)
    mult = np.where(cond, 1.0, 2.0)
    ainv = mult * np.cos(ang_i) / math.sqrt(b)   # (wf, b)  Hermitian fold baked in
    binv = -mult * np.sin(ang_i) / math.sqrt(b)  # (wf, b)
    return cb, sb, fc, fs, ainv, binv


@functools.lru_cache(maxsize=None)
def _build_operators(a, b):
    """Dense real operators for rfft2 (LF) and irfft2 (LI), norm='ortho'.

    Frequency index m = u*wf + v (real part in the first a*wf rows, imaginary
    in the last a*wf rows); spatial index n = p*b + q (matches x.view(B,a,b,C)).
    Cached per (a, b) and returned as bf16 device constants.
    """
    cb, sb, fc, fs, ainv, binv = _dft_mats_np(a, b)
    cbT, sbT = cb.T, sb.T            # (wf, b)
    ainvT, binvT = ainv.T, binv.T    # (b, wf)

    lf_re = np.kron(fc, cbT) - np.kron(fs, sbT)            # (a*wf, a*b)
    lf_im = -(np.kron(fc, sbT) + np.kron(fs, cbT))         # (a*wf, a*b)
    lf = np.concatenate([lf_re, lf_im], axis=0)            # (2*a*wf, N)

    li_re = np.kron(fc, ainvT) + np.kron(fs, binvT)        # (a*b, a*wf)
    li_im = -np.kron(fs, ainvT) + np.kron(fc, binvT)       # (a*b, a*wf)
    li = np.concatenate([li_re, li_im], axis=1)            # (N, 2*a*wf)

    return (jnp.asarray(lf, dtype=jnp.bfloat16),
            jnp.asarray(li, dtype=jnp.bfloat16))


# ---------------------------------------------------------------------------
# Wrapper
# ---------------------------------------------------------------------------
def global_filter_2d_real(block, x, complex_weight, ssf_scale, ssf_shift,
                          spatial_size=None, out_dtype=None):
    """Pallas implementation of GlobalFilter2D_real.forward(block, x)."""
    B, N, C = x.shape
    if spatial_size is None:
        a = b = int(math.sqrt(N))
    else:
        a, b = spatial_size
    wf = b // 2 + 1
    fh = a * wf                       # rows of one (re or im) half spectrum
    f = 2 * fh
    if out_dtype is None:
        # NOTE: the torch module always returns float32; for low-precision x
        # pass out_dtype=jnp.float32 to reproduce that exactly.  Writing in
        # x.dtype halves output HBM traffic.
        out_dtype = x.dtype

    lf, li = _build_operators(a, b)                     # (f, N) bf16, (N, f) bf16

    w = complex_weight[block].astype(jnp.float32)       # (a, wf, C)
    scale = ssf_scale[block].astype(jnp.float32)        # (C,)
    shift = ssf_shift[block].astype(jnp.float32)        # (C,)
    # Fold ssf_scale into the (real) frequency filter: exact, the DFT path is linear.
    ws = (w * scale[None, None, :]).reshape(fh, C)      # (fh, C) f32
    shift2 = shift.reshape(1, C)

    # --- channel padding / lane blocking -----------------------------------
    # Pad channels to a multiple of 128 so output stores are lane-dense, then
    # pick the largest lane block (<= 512) that divides the padded width.
    cp = ((C + 127) // 128) * 128
    if cp != C:
        pad = cp - C
        x_in = jnp.pad(x, ((0, 0), (0, 0), (0, pad)))
        ws = jnp.pad(ws, ((0, 0), (0, pad)))
        shift2 = jnp.pad(shift2, ((0, 0), (0, pad)))
    else:
        x_in = x
    if cp <= 512:
        cblk = cp
    elif cp % 512 == 0:
        cblk = 512
    elif cp % 256 == 0:
        cblk = 256
    else:
        cblk = 128

    # --- batch blocking ------------------------------------------------------
    # Several batch rows per grid step amortize the fixed per-step overhead,
    # capped so the (x + out) blocks stay a few MiB.
    x_bytes = jnp.dtype(x.dtype).itemsize
    o_bytes = jnp.dtype(out_dtype).itemsize
    bblk = 1
    for cand in (8, 4, 2):
        if B % cand == 0 and cand * N * cblk * (x_bytes + o_bytes) <= (4 << 20):
            bblk = cand
            break

    grid = (B // bblk, cp // cblk)

    # --- explicit VMEM budget ------------------------------------------------
    vmem_need = (
        f * N * 2                          # LF bf16, single-buffered
        + N * f * 2                        # LI bf16, single-buffered
        + 2 * fh * cblk * 4                # ws, double-buffered
        + 2 * cblk * 4                     # shift, double-buffered
        + 2 * bblk * N * cblk * x_bytes    # x block, double-buffered
        + 2 * bblk * N * cblk * o_bytes    # out block, double-buffered
        + 3 * f * cblk * 4                 # in-kernel intermediates (t, ws2)
        + 2 * N * cblk * 4                 # y, residual
    )
    vmem_limit = int(min(64 << 20, max(16 << 20, 2 * vmem_need)))

    def _const_spec(shape):
        # Constant operand (same block every grid step): single-buffer it.
        idx = lambda i, j: (0,) * len(shape)
        try:
            return pl.BlockSpec(shape, idx, pipeline_mode=pl.Buffered(1))
        except Exception:  # pragma: no cover — older JAX without pipeline_mode
            return pl.BlockSpec(shape, idx)

    out = pl.pallas_call(
        _gf_kernel,
        out_shape=jax.ShapeDtypeStruct((B, N, cp), out_dtype),
        grid=grid,
        in_specs=[
            pl.BlockSpec((bblk, N, cblk), lambda i, j: (i, 0, j)),   # x (lanes = C)
            _const_spec((f, N)),                                     # LF (constant)
            pl.BlockSpec((fh, cblk), lambda i, j: (0, j)),           # filter * scale
            _const_spec((N, f)),                                     # LI (constant)
            pl.BlockSpec((1, cblk), lambda i, j: (0, j)),            # shift lane vector
        ],
        out_specs=pl.BlockSpec((bblk, N, cblk), lambda i, j: (i, 0, j)),
        compiler_params=pltpu.CompilerParams(
            dimension_semantics=("parallel", "parallel"),
            vmem_limit_bytes=vmem_limit),
    )(x_in, lf, ws, li, shift2)

    if cp != C:
        out = out[..., :C]
    return out


# ---------------------------------------------------------------------------
# Pure-JAX reference mirroring the PyTorch forward
# ---------------------------------------------------------------------------
def _reference(block, x, complex_weight, ssf_scale, ssf_shift):
    B, N, C = x.shape
    a = b = int(math.sqrt(N))
    x4 = x.reshape(B, a, b, C).astype(jnp.float32)
    res = x4
    X = jnp.fft.rfft2(x4, axes=(1, 2), norm="ortho")
    X = X * complex_weight[block]            # .squeeze() is a no-op for these shapes
    y = jnp.fft.irfft2(X, s=(a, b), axes=(1, 2), norm="ortho")
    y = y * ssf_scale[block] + ssf_shift[block]
    y = y + res
    return y.reshape(B, N, C)


if __name__ == "__main__":
    # small shapes consistent with the module: N = a*b, h = a, w = b//2 + 1
    blocks, dim = 3, 16
    B, a, b = 2, 8, 8
    N = a * b
    h, w = a, b // 2 + 1

    key = jax.random.PRNGKey(0)
    k_x, k_w, k_sc, k_sh = jax.random.split(key, 4)
    x = jax.random.normal(k_x, (B, N, dim), dtype=jnp.float32)
    # deterministic parameter init matching __init__ (randn*0.02, N(1,0.02), N(0,0.02))
    complex_weight = 0.02 * jax.random.normal(k_w, (blocks, h, w, dim), dtype=jnp.float32)
    ssf_scale = 1.0 + 0.02 * jax.random.normal(k_sc, (blocks, dim), dtype=jnp.float32)
    ssf_shift = 0.02 * jax.random.normal(k_sh, (blocks, dim), dtype=jnp.float32)

    block = 1
    out = global_filter_2d_real(block, x, complex_weight, ssf_scale, ssf_shift)
    out = jax.block_until_ready(out)

    ref = _reference(block, x, complex_weight, ssf_scale, ssf_shift)
    assert out.shape == (B, N, dim) and out.dtype == jnp.float32
    err = float(jnp.max(jnp.abs(out - ref)))
    # bf16 matmul path: typical max-abs error is a few 1e-3 at these shapes.
    assert err < 2e-2, f"max abs error vs reference: {err}"
    print("KERNEL_OK")
</pallas_src>

<mosaic_0001>
module attributes {stable_mosaic.version = 11 : i64} {
  func.func @_gf_kernel(%arg0: i32, %arg1: i32, %arg2: memref<2x64x128xf32, #tpu.memory_space<vmem>>, %arg3: memref<80x64xbf16, #tpu.memory_space<vmem>>, %arg4: memref<40x128xf32, #tpu.memory_space<vmem>>, %arg5: memref<64x80xbf16, #tpu.memory_space<vmem>>, %arg6: memref<1x128xf32, #tpu.memory_space<vmem>>, %arg7: memref<2x64x128xf32, #tpu.memory_space<vmem>>) attributes {dimension_semantics = [#tpu.dimension_semantics<parallel>, #tpu.dimension_semantics<parallel>], iteration_bounds = array<i64: 1, 1>, scalar_prefetch = 0 : i64, scratch_operands = 0 : i64, tpu.core_type = #tpu.core_type<tc>, window_params = [{transform_indices = @transform_0, window_bounds = array<i64: 2, 64, 128>}, {pipeline_mode = #tpu.pipeline_mode<synchronous>, transform_indices = @transform_1, window_bounds = array<i64: 80, 64>}, {transform_indices = @transform_2, window_bounds = array<i64: 40, 128>}, {pipeline_mode = #tpu.pipeline_mode<synchronous>, transform_indices = @transform_3, window_bounds = array<i64: 64, 80>}, {transform_indices = @transform_4, window_bounds = array<i64: 1, 128>}, {transform_indices = @transform_5, window_bounds = array<i64: 2, 64, 128>}]} {
    %c0 = arith.constant 0 : index
    %c0_0 = arith.constant 0 : index
    %0 = vector.load %arg4[%c0, %c0_0] : memref<40x128xf32, #tpu.memory_space<vmem>>, vector<40x128xf32>
    %1 = tpu.concatenate %0, %0 in 0 : vector<40x128xf32>, vector<40x128xf32> -> vector<80x128xf32>
    %c0_1 = arith.constant 0 : index
    %c0_2 = arith.constant 0 : index
    %2 = vector.load %arg6[%c0_1, %c0_2] : memref<1x128xf32, #tpu.memory_space<vmem>>, vector<1x128xf32>
    %c0_3 = arith.constant 0 : index
    %c0_4 = arith.constant 0 : index
    %c0_5 = arith.constant 0 : index
    %3 = vector.load %arg2[%c0_3, %c0_4, %c0_5] : memref<2x64x128xf32, #tpu.memory_space<vmem>>, vector<1x64x128xf32>
    %4 = vector.shape_cast %3 : vector<1x64x128xf32> to vector<64x128xf32>
    %c0_6 = arith.constant 0 : index
    %c0_7 = arith.constant 0 : index
    %5 = vector.load %arg3[%c0_6, %c0_7] : memref<80x64xbf16, #tpu.memory_space<vmem>>, vector<80x64xbf16>
    %6 = arith.truncf %4 : vector<64x128xf32> to vector<64x128xbf16>
    %cst = arith.constant dense<0.000000e+00> : vector<80x128xf32>
    %7 = tpu.matmul %5, %6, %cst {dimension_numbers = #tpu.dot_dimension_numbers<[1], [0], [0], [1], [0, 0, 1, 1], [], []>} : vector<80x64xbf16>, vector<64x128xbf16>, vector<80x128xf32> -> vector<80x128xf32>
    %8 = arith.mulf %7, %1 : vector<80x128xf32>
    %c0_8 = arith.constant 0 : index
    %c0_9 = arith.constant 0 : index
    %9 = vector.load %arg5[%c0_8, %c0_9] : memref<64x80xbf16, #tpu.memory_space<vmem>>, vector<64x80xbf16>
    %10 = arith.truncf %8 : vector<80x128xf32> to vector<80x128xbf16>
    %cst_10 = arith.constant dense<0.000000e+00> : vector<64x128xf32>
    %11 = tpu.matmul %9, %10, %cst_10 {dimension_numbers = #tpu.dot_dimension_numbers<[1], [0], [0], [1], [0, 0, 1, 1], [], []>} : vector<64x80xbf16>, vector<80x128xbf16>, vector<64x128xf32> -> vector<64x128xf32>
    %12 = vector.broadcast %2 : vector<1x128xf32> to vector<64x128xf32>
    %13 = arith.addf %11, %12 : vector<64x128xf32>
    %14 = arith.addf %13, %4 : vector<64x128xf32>
    %c0_11 = arith.constant 0 : index
    %c0_12 = arith.constant 0 : index
    %c0_13 = arith.constant 0 : index
    %15 = vector.load %arg7[%c0_11, %c0_12, %c0_13] : memref<2x64x128xf32, #tpu.memory_space<vmem>>, vector<1x64x128xf32>
    %16 = vector.shape_cast %15 : vector<1x64x128xf32> to vector<64x128xf32>
    %17 = vector.shape_cast %14 : vector<64x128xf32> to vector<1x64x128xf32>
    tpu.vector_store %arg7[%c0_11, %c0_12, %c0_13], %17 {strides = array<i32>} : memref<2x64x128xf32, #tpu.memory_space<vmem>>, vector<1x64x128xf32>,
    %c1 = arith.constant 1 : index
    %c0_14 = arith.constant 0 : index
    %c0_15 = arith.constant 0 : index
    %18 = vector.load %arg2[%c1, %c0_14, %c0_15] : memref<2x64x128xf32, #tpu.memory_space<vmem>>, vector<1x64x128xf32>
    %19 = vector.shape_cast %18 : vector<1x64x128xf32> to vector<64x128xf32>
    %c0_16 = arith.constant 0 : index
    %c0_17 = arith.constant 0 : index
    %20 = vector.load %arg3[%c0_16, %c0_17] : memref<80x64xbf16, #tpu.memory_space<vmem>>, vector<80x64xbf16>
    %21 = arith.truncf %19 : vector<64x128xf32> to vector<64x128xbf16>
    %cst_18 = arith.constant dense<0.000000e+00> : vector<80x128xf32>
    %22 = tpu.matmul %20, %21, %cst_18 {dimension_numbers = #tpu.dot_dimension_numbers<[1], [0], [0], [1], [0, 0, 1, 1], [], []>} : vector<80x64xbf16>, vector<64x128xbf16>, vector<80x128xf32> -> vector<80x128xf32>
    %23 = arith.mulf %22, %1 : vector<80x128xf32>
    %c0_19 = arith.constant 0 : index
    %c0_20 = arith.constant 0 : index
    %24 = vector.load %arg5[%c0_19, %c0_20] : memref<64x80xbf16, #tpu.memory_space<vmem>>, vector<64x80xbf16>
    %25 = arith.truncf %23 : vector<80x128xf32> to vector<80x128xbf16>
    %cst_21 = arith.constant dense<0.000000e+00> : vector<64x128xf32>
    %26 = tpu.matmul %24, %25, %cst_21 {dimension_numbers = #tpu.dot_dimension_numbers<[1], [0], [0], [1], [0, 0, 1, 1], [], []>} : vector<64x80xbf16>, vector<80x128xbf16>, vector<64x128xf32> -> vector<64x128xf32>
    %27 = vector.broadcast %2 : vector<1x128xf32> to vector<64x128xf32>
    %28 = arith.addf %26, %27 : vector<64x128xf32>
    %29 = arith.addf %28, %19 : vector<64x128xf32>
    %c1_22 = arith.constant 1 : index
    %c0_23 = arith.constant 0 : index
    %c0_24 = arith.constant 0 : index
    %30 = vector.load %arg7[%c1_22, %c0_23, %c0_24] : memref<2x64x128xf32, #tpu.memory_space<vmem>>, vector<1x64x128xf32>
    %31 = vector.shape_cast %30 : vector<1x64x128xf32> to vector<64x128xf32>
    %32 = vector.shape_cast %29 : vector<64x128xf32> to vector<1x64x128xf32>
    tpu.vector_store %arg7[%c1_22, %c0_23, %c0_24], %32 {strides = array<i32>} : memref<2x64x128xf32, #tpu.memory_space<vmem>>, vector<1x64x128xf32>,
    return
  }
  func.func @transform_0(%arg0: i32, %arg1: i32) -> (i32, i32, i32) {
    %c0_i32 = arith.constant 0 : i32
    %c0_i32_0 = arith.constant 0 : i32
    return %arg0, %c0_i32, %arg1 : i32, i32, i32
  }
  func.func @transform_1(%arg0: i32, %arg1: i32) -> (i32, i32) {
    %c0_i32 = arith.constant 0 : i32
    %c0_i32_0 = arith.constant 0 : i32
    %c0_i32_1 = arith.constant 0 : i32
    return %c0_i32, %c0_i32_0 : i32, i32
  }
  func.func @transform_2(%arg0: i32, %arg1: i32) -> (i32, i32) {
    %c0_i32 = arith.constant 0 : i32
    %c0_i32_0 = arith.constant 0 : i32
    return %c0_i32, %arg1 : i32, i32
  }
  func.func @transform_3(%arg0: i32, %arg1: i32) -> (i32, i32) {
    %c0_i32 = arith.constant 0 : i32
    %c0_i32_0 = arith.constant 0 : i32
    %c0_i32_1 = arith.constant 0 : i32
    return %c0_i32, %c0_i32_0 : i32, i32
  }
  func.func @transform_4(%arg0: i32, %arg1: i32) -> (i32, i32) {
    %c0_i32 = arith.constant 0 : i32
    %c0_i32_0 = arith.constant 0 : i32
    return %c0_i32, %arg1 : i32, i32
  }
  func.func @transform_5(%arg0: i32, %arg1: i32) -> (i32, i32, i32) {
    %c0_i32 = arith.constant 0 : i32
    %c0_i32_0 = arith.constant 0 : i32
    return %arg0, %c0_i32, %arg1 : i32, i32, i32
  }
}

</mosaic_0001>

<bundles_post_ra>
// kernel: tpu_custom_call.1
= control target key start
LH: loop header
LB: loop body
LE: loop exit
PB: predicated region body
PF: predicated region fallthrough
CT: control target
= control target key end

     0   :  { %10 = vsyncpa [#allocation3], 0  ;;  %s845_s0 = inlined_call_operand.hbm [shape: f32[2,64,128], index: 0, kind: input, shape index: {}]   ;;  %s846_s1 = inlined_call_operand.vmem [shape: bf16[80,64], index: 1, kind: input, shape index: {}]   ;;  %s847_s2 = inlined_call_operand.vmem [shape: f32[40,128], index: 2, kind: input, shape index: {}]   ;;  %s848_s3 = inlined_call_operand.vmem [shape: bf16[64,80], index: 3, kind: input, shape index: {}]   ;;  %s849_s4 = inlined_call_operand.vmem [shape: f32[1,128], index: 4, kind: input, shape index: {}]   ;;  %s850_s5 = inlined_call_operand.hbm [shape: f32[2,64,128], index: 5, kind: output, shape index: {}]  }
   0x1   :  { %11 = vsyncpa [#allocation4], 0  ;;  %s16_s20 = sshll.u32 %s845_s0, 4  ;;  %s627_s21 = smov [#allocation2]   ;;  %s17_s20 = int_to_ptr.hbm [resolvable:$true] %s16_s20 }
   0x2   :  { %s18_s22 = sshll.u32 %s627_s21, 4  ;;  %s628_s23 = smov 128   ;;  %s19_s22 = int_to_ptr.vmem [resolvable:$true] %s18_s22 }
   0x3   :  { %s629_s24 = smov 8  }
   0x4   :  { %24 = dma.hbm_to_vmem [thread:$0]  %s17_s20, 2048, %s19_s22, [#allocation3], %s628_s23, %s628_s23, %s629_s24  }
   0x5   :  { %623 = dma.done.wait [#allocation3], 2048  }
   0x6   :  { %624 = vsyncadd [#allocation3], 4294965248  ;;  %v667_v0 = vld [vmem:[#allocation2 + $0x30] sm:$0xff]  ;;  %v669_v1 = vld [vmem:[#allocation2 + $0x38] sm:$0xff]  ;;  %vm91_vm0 = vcmask 523264   ;;  %vm187_vm1 = vcmask 654336  }
   0x7   :  { %v671_v2 = vld [vmem:[#allocation2 + $0x70] sm:$0xff]  ;;  %v65_v3 = vpack.c.bf16 %v669_v1, %v667_v0  ;;  %v675_v4 = vld [vmem:[#allocation2 + $0x78] sm:$0xff]  ;;  %v677_v5 = vld [vmem:[#allocation2 + $0x20] sm:$0xff] }
   0x8   :  { %v679_v6 = vld [vmem:[#allocation2 + $0x28] sm:$0xff]  ;;  %v267_v7 = vpack.c.bf16 %v675_v4, %v671_v2  ;;  %v683_v8 = vld [vmem:[#allocation2 + $0x60] sm:$0xff]  ;;  %v691_v12 = vld [vmem:[#allocation2 + $0x10] sm:$0xff] }
   0x9   :  { %v685_v9 = vld [vmem:[#allocation2 + $0x68] sm:$0xff]  ;;  %111 = vmatpush.bf16.msra.mxu0 %v65_v3  ;;  %v64_v10 = vpack.c.bf16 %v679_v6, %v677_v5  ;;  %v693_v13 = vld [vmem:[#allocation2 + $0x18] sm:$0xff]  ;;  %v695_v14 = vld [vmem:[#allocation2 + $0x50] sm:$0xff] }
   0xa   :  { %312 = vmatpush.bf16.msra.mxu2 %v267_v7  ;;  %v266_v11 = vpack.c.bf16 %v685_v9, %v683_v8  ;;  %v697_v15 = vld [vmem:[#allocation2 + $0x58] sm:$0xff]  ;;  %v63_v16 = vpack.c.bf16 %v693_v13, %v691_v12  ;;  %v703_v18 = vld [vmem:[#allocation2] sm:$0xff]  ;;  %v705_v19 = vld [vmem:[#allocation2 + $0x8] sm:$0xff] }
   0xb   :  { %v265_v17 = vpack.c.bf16 %v697_v15, %v695_v14  ;;  %v707_v20 = vld [vmem:[#allocation2 + $0x40] sm:$0xff]  ;;  %v709_v21 = vld [vmem:[#allocation2 + $0x48] sm:$0xff]  ;;  %v62_v22 = vpack.c.bf16 %v705_v19, %v703_v18  ;;  %v554_v28 = vld [vmem:[%s846_s1 + $0x10] sm:$0xff] }
   0xc   :  { %v264_v23 = vpack.c.bf16 %v709_v21, %v707_v20  ;;  %v552_v24 = vld [vmem:[%s846_s1] sm:$0xff]  ;;  %v553_v26 = vld [vmem:[%s846_s1 + $0x8] sm:$0xff]  ;;  %v563_v29 = vld [vmem:[%s846_s1 + $0x10] sm:$0xff] }
   0xd   :  { %112 = vmatpush.bf16.msra.mxu0 %v64_v10  ;;  %v561_v25 = vld [vmem:[%s846_s1] sm:$0xff]  ;;  %v562_v27 = vld [vmem:[%s846_s1 + $0x8] sm:$0xff]  ;;  %v555_v30 = vld [vmem:[%s846_s1 + $0x18] sm:$0xff] }
   0xe   :  { %313 = vmatpush.bf16.msra.mxu2 %v266_v11  ;;  %v564_v31 = vld [vmem:[%s846_s1 + $0x18] sm:$0xff]  ;;  %v556_v32 = vld [vmem:[%s846_s1 + $0x20] sm:$0xff]  ;;  %v39_v36 = vld [vmem:[%s847_s2 + $0x8] sm:$0xff] }
   0xf   :  { %v565_v33 = vld [vmem:[%s846_s1 + $0x20] sm:$0xff]  ;;  %v41_v59 = vld [vmem:[%s847_s2 + $0x18] sm:$0xff]  ;;  %v40_v7 = vld [vmem:[%s847_s2 + $0x10] sm:$0xff]  ;;  %s449_s1 = sshll.u32 %s850_s5, 4  ;;  %s450_s1 = int_to_ptr.hbm [resolvable:$true] %s449_s1 }
  0x10   :  { %v38_v35 = vld [vmem:[%s847_s2] sm:$0xff] }
  0x11   :  { %113 = vmatpush.bf16.msra.mxu0 %v63_v16  ;;  %v42_v62 = vld [vmem:[%s847_s2 + $0x20] sm:$0xff] }
  0x12   :  { %314 = vmatpush.bf16.msra.mxu2 %v265_v17 }
  0x15   :  { %114 = vmatpush.bf16.msra.mxu0 %v62_v22 }
  0x16   :  { %315 = vmatpush.bf16.msra.mxu2 %v264_v23 }
  0x18   :  { %482 = vmatmul.msk.bf16.vlgmr.msra.gmra.mxu0 %vm91_vm0, %v552_v24 }
  0x19   :  { %527 = vmatmul.msk.bf16.vlgmr.msra.gmra.mxu2 %vm91_vm0, %v561_v25 }
  0x28   :  { %483 = vmatmul.msk.bf16.gmra.mxu0 %vm91_vm0, %v553_v26 }
  0x29   :  { %528 = vmatmul.msk.bf16.gmra.mxu2 %vm91_vm0, %v562_v27 }
  0x38   :  { %484 = vmatmul.msk.bf16.gmra.mxu0 %vm91_vm0, %v554_v28 }
  0x39   :  { %529 = vmatmul.msk.bf16.gmra.mxu2 %vm91_vm0, %v563_v29 }
  0x48   :  { %485 = vmatmul.msk.bf16.gmra.mxu0 %vm91_vm0, %v555_v30 }
  0x49   :  { %530 = vmatmul.msk.bf16.gmra.mxu2 %vm91_vm0, %v564_v31 }
  0x58   :  { %486 = vmatmul.msk.bf16.gmra.mxu0 %vm91_vm0, %v556_v32 }
  0x59   :  { %531 = vmatmul.msk.bf16.gmra.mxu2 %vm91_vm0, %v565_v33 }
  0x95   :  { %v116_v34 = vpop.f32.mrf.mxu0 }
  0x96   :  { %v141_v37 = vmul.f32 %v116_v34, %v38_v35 }
  0x9c   :  { %v317_v38 = vpop.f32.mrf.mxu2 }
  0x9d   :  { %v118_v39 = vpop.f32.mrf.mxu0  ;;  %v342_v43 = vmul.f32 %v317_v38, %v38_v35 }
  0x9e   :  { %v142_v40 = vmul.f32 %v118_v39, %v39_v36 }
  0xa0   :  { %v159_v41 = vpack.c.bf16 %v142_v40, %v141_v37 }
  0xa4   :  { %v319_v42 = vpop.f32.mrf.mxu2 }
  0xa5   :  { %v343_v44 = vmul.f32 %v319_v42, %v39_v36  ;;  %v121_v45 = vpop.f32.mrf.mxu0 }
  0xa6   :  { %v143_v29 = vmul.f32 %v121_v45, %v40_v7  ;;  %v559_v45 = vld [vmem:[%s848_s3 + $0x10] sm:$0xff] }
  0xa7   :  { %v360_v46 = vpack.c.bf16 %v343_v44, %v342_v43  ;;  %v557_v43 = vld [vmem:[%s848_s3] sm:$0xff] }
  0xac   :  { %v322_v47 = vpop.f32.mrf.mxu2 }
  0xad   :  { %v123_v48 = vpop.f32.mrf.mxu0  ;;  %v344_v42 = vmul.f32 %v322_v47, %v40_v7  ;;  %v560_v47 = vld [vmem:[%s848_s3 + $0x18] sm:$0xff] }
  0xae   :  { %v144_v30 = vmul.f32 %v123_v48, %v41_v59  ;;  %v569_v48 = vld [vmem:[%s848_s3 + $0x18] sm:$0xff] }
  0xb0   :  { %v160_v37 = vpack.c.bf16 %v144_v30, %v143_v29 }
  0xb4   :  { %v324_v49 = vpop.f32.mrf.mxu2 }
  0xb5   :  { %v126_v50 = vpop.f32.mrf.mxu0  ;;  %v345_v39 = vmul.f32 %v324_v49, %v41_v59  ;;  %v805_v49 = vld [vmem:[%s849_s4] ss:$0 sm:$0xff] }
  0xb6   :  { %v145_v17 = vmul.f32 %v126_v50, %v42_v62 }
  0xb7   :  { %v361_v44 = vpack.c.bf16 %v345_v39, %v344_v42 }
  0xbc   :  { %v327_v51 = vpop.f32.mrf.mxu2 }
  0xbd   :  { %v128_v52 = vpop.f32.mrf.mxu0  ;;  %v346_v38 = vmul.f32 %v327_v51, %v42_v62 }
  0xbe   :  { %v146_v22 = vmul.f32 %v128_v52, %v38_v35 }
  0xc0   :  { %v161_v31 = vpack.c.bf16 %v146_v22, %v145_v17 }
  0xc4   :  { %v329_v53 = vpop.f32.mrf.mxu2 }
  0xc5   :  { %v131_v54 = vpop.f32.mrf.mxu0  ;;  %v347_v33 = vmul.f32 %v329_v53, %v38_v35  ;;  %v566_v35 = vld [vmem:[%s848_s3] sm:$0xff] }
  0xc6   :  { %v147_v10 = vmul.f32 %v131_v54, %v39_v36 }
  0xc7   :  { %v362_v40 = vpack.c.bf16 %v347_v33, %v346_v38 }
  0xcc   :  { %v332_v55 = vpop.f32.mrf.mxu2 }
  0xcd   :  { %v133_v56 = vpop.f32.mrf.mxu0  ;;  %v348_v32 = vmul.f32 %v332_v55, %v39_v36  ;;  %v558_v36 = vld [vmem:[%s848_s3 + $0x8] sm:$0xff] }
  0xce   :  { %v148_v11 = vmul.f32 %v133_v56, %v40_v7 }
  0xd0   :  { %v162_v24 = vpack.c.bf16 %v148_v11, %v147_v10 }
  0xd4   :  { %v334_v57 = vpop.f32.mrf.mxu2 }
  0xd5   :  { %v136_v58 = vpop.f32.mrf.mxu0  ;;  %v349_v27 = vmul.f32 %v334_v57, %v40_v7 }
  0xd6   :  { %v149_v60 = vmul.f32 %v136_v58, %v41_v59 }
  0xd7   :  { %v363_v34 = vpack.c.bf16 %v349_v27, %v348_v32 }
  0xdc   :  { %v337_v61 = vpop.f32.mrf.mxu2 }
  0xdd   :  { %v138_v63 = vpop.f32.mrf.mxu0  ;;  %v350_v25 = vmul.f32 %v337_v61, %v41_v59 }
  0xde   :  { %v150_v3 = vmul.f32 %v138_v63, %v42_v62 }
  0xe0   :  { %v163_v16 = vpack.c.bf16 %v150_v3, %v149_v60 }
  0xe2   :  { %203 = vmatpush.bf16.msra.mxu1 %v163_v16 }
  0xe4   :  { %v339_v23 = vpop.f32.mrf.mxu2 }
  0xe5   :  { %v351_v26 = vmul.f32 %v339_v23, %v42_v62 }
  0xe6   :  { %204 = vmatpush.bf16.msra.mxu1 %v162_v24 }
  0xe7   :  { %v364_v28 = vpack.c.bf16 %v351_v26, %v350_v25 }
  0xe9   :  { %400 = vmatpush.bf16.msra.mxu3 %v364_v28 }
  0xea   :  { %205 = vmatpush.bf16.msra.mxu1 %v161_v31 }
  0xed   :  { %401 = vmatpush.bf16.msra.mxu3 %v363_v34 }
  0xee   :  { %206 = vmatpush.bf16.msra.mxu1 %v160_v37 }
  0xf1   :  { %402 = vmatpush.bf16.msra.mxu3 %v362_v40 }
  0xf2   :  { %207 = vmatpush.bf16.msra.mxu1 %v159_v41  ;;  %v567_v41 = vld [vmem:[%s848_s3 + $0x8] sm:$0xff] }
  0xf5   :  { %403 = vmatpush.bf16.msra.mxu3 %v361_v44  ;;  %503 = vmatmul.msk.bf16.vlgmr.msra.gmra.mxu1 %vm187_vm1, %v557_v43 }
  0xf9   :  { %404 = vmatpush.bf16.msra.mxu3 %v360_v46  ;;  %v568_v46 = vld [vmem:[%s848_s3 + $0x10] sm:$0xff]  ;;  %s630_s3 = smov [#allocation5]  }
  0xfa   :  { %s447_s4 = sshll.u32 %s630_s3, 4  ;;  %s448_s4 = int_to_ptr.vmem [resolvable:$true] %s447_s4 }
  0xfc   :  { %548 = vmatmul.msk.bf16.vlgmr.msra.gmra.mxu3 %vm187_vm1, %v566_v35 }
 0x105   :  { %504 = vmatmul.msk.bf16.gmra.mxu1 %vm187_vm1, %v558_v36 }
 0x10c   :  { %549 = vmatmul.msk.bf16.gmra.mxu3 %vm187_vm1, %v567_v41 }
 0x115   :  { %505 = vmatmul.msk.bf16.gmra.mxu1 %vm187_vm1, %v559_v45 }
 0x11c   :  { %550 = vmatmul.msk.bf16.gmra.mxu3 %vm187_vm1, %v568_v46 }
 0x125   :  { %506 = vmatmul.msk.bf16.gmra.mxu1 %vm187_vm1, %v560_v47 }
 0x12c   :  { %551 = vmatmul.msk.bf16.gmra.mxu3 %vm187_vm1, %v569_v48 }
 0x172   :  { %v209_v50 = vpop.f32.mrf.mxu1 }
 0x173   :  { %v210_v51 = vadd.f32 %v805_v49, %v209_v50 }
 0x175   :  { %v229_v52 = vadd.f32 %v210_v51, %v703_v18 }
 0x177   :  { %237 = vst [vmem:[#allocation5] sm:$0xff] %v229_v52 }
 0x17a   :  { %v211_v53 = vpop.f32.mrf.mxu1 }
 0x17b   :  { %v212_v54 = vadd.f32 %v805_v49, %v211_v53 }
 0x17d   :  { %v230_v55 = vadd.f32 %v212_v54, %v705_v19 }
 0x17f   :  { %238 = vst [vmem:[#allocation5 + $0x8] sm:$0xff] %v230_v55  ;;  %v406_v56 = vpop.f32.mrf.mxu3 }
 0x180   :  { %v407_v57 = vadd.f32 %v805_v49, %v406_v56 }
 0x182   :  { %v426_v58 = vadd.f32 %v407_v57, %v707_v20  ;;  %v214_v59 = vpop.f32.mrf.mxu1 }
 0x183   :  { %v215_v60 = vadd.f32 %v805_v49, %v214_v59 }
 0x184   :  { %435 = vst [vmem:[#allocation5 + $0x40] sm:$0xff] %v426_v58 }
 0x185   :  { %v231_v61 = vadd.f32 %v215_v60, %v691_v12 }
 0x187   :  { %239 = vst [vmem:[#allocation5 + $0x10] sm:$0xff] %v231_v61  ;;  %v408_v18 = vpop.f32.mrf.mxu3 }
 0x188   :  { %v409_v62 = vadd.f32 %v805_v49, %v408_v18 }
 0x18a   :  { %v427_v63 = vadd.f32 %v409_v62, %v709_v21  ;;  %v216_v3 = vpop.f32.mrf.mxu1 }
 0x18b   :  { %v217_v19 = vadd.f32 %v805_v49, %v216_v3 }
 0x18c   :  { %436 = vst [vmem:[#allocation5 + $0x48] sm:$0xff] %v427_v63 }
 0x18d   :  { %v232_v7 = vadd.f32 %v217_v19, %v693_v13 }
 0x18f   :  { %240 = vst [vmem:[#allocation5 + $0x18] sm:$0xff] %v232_v7  ;;  %v411_v20 = vpop.f32.mrf.mxu3 }
 0x190   :  { %v412_v10 = vadd.f32 %v805_v49, %v411_v20 }
 0x192   :  { %v428_v11 = vadd.f32 %v412_v10, %v695_v14  ;;  %v219_v16 = vpop.f32.mrf.mxu1 }
 0x193   :  { %v220_v12 = vadd.f32 %v805_v49, %v219_v16 }
 0x194   :  { %437 = vst [vmem:[#allocation5 + $0x50] sm:$0xff] %v428_v11 }
 0x195   :  { %v233_v17 = vadd.f32 %v220_v12, %v677_v5 }
 0x197   :  { %241 = vst [vmem:[#allocation5 + $0x20] sm:$0xff] %v233_v17  ;;  %v413_v21 = vpop.f32.mrf.mxu3 }
 0x198   :  { %v414_v22 = vadd.f32 %v805_v49, %v413_v21 }
 0x19a   :  { %v429_v23 = vadd.f32 %v414_v22, %v697_v15  ;;  %v221_v24 = vpop.f32.mrf.mxu1 }
 0x19b   :  { %v222_v13 = vadd.f32 %v805_v49, %v221_v24 }
 0x19c   :  { %438 = vst [vmem:[#allocation5 + $0x58] sm:$0xff] %v429_v23 }
 0x19d   :  { %v234_v25 = vadd.f32 %v222_v13, %v679_v6 }
 0x19f   :  { %242 = vst [vmem:[#allocation5 + $0x28] sm:$0xff] %v234_v25  ;;  %v416_v14 = vpop.f32.mrf.mxu3 }
 0x1a0   :  { %v417_v26 = vadd.f32 %v805_v49, %v416_v14 }
 0x1a2   :  { %v430_v27 = vadd.f32 %v417_v26, %v683_v8  ;;  %v224_v28 = vpop.f32.mrf.mxu1 }
 0x1a3   :  { %v225_v5 = vadd.f32 %v805_v49, %v224_v28 }
 0x1a4   :  { %439 = vst [vmem:[#allocation5 + $0x60] sm:$0xff] %v430_v27 }
 0x1a5   :  { %v235_v29 = vadd.f32 %v225_v5, %v667_v0 }
 0x1a7   :  { %243 = vst [vmem:[#allocation5 + $0x30] sm:$0xff] %v235_v29  ;;  %v418_v15 = vpop.f32.mrf.mxu3 }
 0x1a8   :  { %v419_v30 = vadd.f32 %v805_v49, %v418_v15 }
 0x1aa   :  { %v431_v31 = vadd.f32 %v419_v30, %v685_v9  ;;  %v226_v32 = vpop.f32.mrf.mxu1 }
 0x1ab   :  { %v227_v6 = vadd.f32 %v805_v49, %v226_v32 }
 0x1ac   :  { %440 = vst [vmem:[#allocation5 + $0x68] sm:$0xff] %v431_v31 }
 0x1ad   :  { %v236_v33 = vadd.f32 %v227_v6, %v669_v1 }
 0x1af   :  { %244 = vst [vmem:[#allocation5 + $0x38] sm:$0xff] %v236_v33  ;;  %v421_v8 = vpop.f32.mrf.mxu3 }
 0x1b0   :  { %v422_v34 = vadd.f32 %v805_v49, %v421_v8 }
 0x1b2   :  { %v432_v37 = vadd.f32 %v422_v34, %v671_v2 }
 0x1b4   :  { %441 = vst [vmem:[#allocation5 + $0x70] sm:$0xff] %v432_v37 }
 0x1b7   :  { %v423_v0 = vpop.f32.mrf.mxu3 }
 0x1b8   :  { %v424_v9 = vadd.f32 %v805_v49, %v423_v0 }
 0x1ba   :  { %v433_v38 = vadd.f32 %v424_v9, %v675_v4 }
 0x1bc   :  { %442 = vst [vmem:[#allocation5 + $0x78] sm:$0xff] %v433_v38 }
 0x1bd   :  { %455 = dma.vmem_to_hbm [thread:$0]  %s448_s4, 2048, %s450_s1, [#allocation4], %s628_s23, %s628_s23, %s629_s24  }
 0x1be   :  { %625 = dma.done.wait [#allocation4], 2048  }
 0x1bf   :  { %626 = vsyncadd [#allocation4], 4294965248 }
 0x1c0   :  { %460 = vsyncpa [#allocation3], 1 }
 0x1c1   :  { %461 = vsyncpa [#allocation4], 1 }

</bundles_post_ra>
